<compile_context>
chip_gen: v6e
topology: v6e:2x2x1
jax: 0.10.0
libtpu: 0.0.40
codegen_flags: <defaults>
</compile_context>

<pallas_src>
import math

import jax
import jax.numpy as jnp
from jax.experimental import pallas as pl
from jax.experimental.pallas import tpu as pltpu


# --------------------------------------------------------------------------
# in-kernel activation helpers
# --------------------------------------------------------------------------
def _gelu(x):
    # TODO(synk): PyTorch nn.GELU() defaults to the exact erf formulation; the
    # tanh approximation is used here for robust Mosaic lowering (diff ~1e-3).
    return jax.nn.gelu(x, approximate=True)


def _softplus(x):
    # numerically stable log(1 + exp(x))
    return jnp.maximum(x, 0.0) + jnp.log(1.0 + jnp.exp(-jnp.abs(x)))


# --------------------------------------------------------------------------
# fused Pallas kernel
#   inputs:
#     attw_ref   SMEM (2,)          [wq*wk, wv]
#     kl_ref     VMEM (4B, T*L)     rows: [mu_p | std_p | mu_q | std_q]
#     vec_ref    VMEM (B, H+2W)     lanes: [ z | eps_mean | pe ]
#     w_head_ref VMEM (max(H,2W), 6W)  lanes: [ W1 | blkdiag(Wm2,Ws2) | blkdiag(Wm3,Ws3) ]
#     w_gen_ref  VMEM (W, 4W)       lanes: [ g1 | g2 | g3 | g4 ]
#     b_ref      VMEM (8, 2W)       rows:  [ b1 | bbd2 | bbd3 | bg1..bg4 | 0 ]
#   outputs:
#     out_ref    VMEM (B, W)
#     kl_out_ref SMEM (1, 1)
# --------------------------------------------------------------------------
def _fused_kernel(attw_ref, kl_ref, vec_ref, w_head_ref, w_gen_ref, b_ref,
                  out_ref, kl_out_ref):
    B, W = out_ref.shape
    W2 = 2 * W
    H = vec_ref.shape[1] - W2

    # ---- KL(post || prior), summed, / batch  (models utils.get_kl) ----------
    klin = kl_ref[...]                              # one dense (8,128) f32 tile
    mu_p = klin[0 * B:1 * B]
    std_p = klin[1 * B:2 * B]
    mu_q = klin[2 * B:3 * B]
    std_q = klin[3 * B:4 * B]
    var_p = std_p * std_p
    var_q = std_q * std_q
    diff = mu_q - mu_p
    # single log of the ratio; exact division kept (feeds a loss value).
    kl = jnp.log(std_p / std_q) + 0.5 * (var_q + diff * diff) / var_p - 0.5
    kl_out_ref[0, 0] = jnp.sum(kl) * (1.0 / B)

    # ---- vector slab: z | eps_mean | pe --------------------------------------
    vec = vec_ref[...]                              # (B, H + 2W)
    z = vec[:, :H]                                  # (B, H)
    eps_mean = vec[:, H:H + W]                      # (B, W)
    pe = vec[:, H + W:H + W2]                       # (B, W)

    wh = w_head_ref[...]                            # (max(H,2W), 6W)
    bs = b_ref[...]                                 # (8, 2W)

    # fused dec_mean/dec_std layer 1: one (B,H)x(H,2W) matmul
    h = jnp.dot(z, wh[:H, 0:W2], preferred_element_type=jnp.float32) + bs[0:1, :]
    h = _gelu(h)

    # block-diagonal layer 2 (Wm2 ⊕ Ws2): one matmul, split activation by lane
    h = jnp.dot(h, wh[:W2, W2:2 * W2], preferred_element_type=jnp.float32) + bs[1:2, :]
    col = jax.lax.broadcasted_iota(jnp.int32, (B, W2), 1)
    h = jnp.where(col < W, _gelu(h), _softplus(h))

    # block-diagonal layer 3 (Wm3 ⊕ Ws3): one matmul -> [mu | std]
    h = jnp.dot(h, wh[:W2, 2 * W2:3 * W2], preferred_element_type=jnp.float32) + bs[2:3, :]
    mu = h[:, :W]
    std = h[:, W:]      # plain Linear output (may be negative), matching the spec

    # (1/N) * sum_i (mu + std*eps_i)  ==  mu + std * mean_i(eps_i)
    g = mu + std * eps_mean                         # (B, W)

    # input = (last_x + position_emd * last_x).permute(0,2,1)  ==  g*(1+pe)
    x_tok = g * (1.0 + pe)                          # (B, W)

    # utils.SelfAttention(1,1,1): scalar q/k/v projections, scale = 1/sqrt(1).
    wqk = attw_ref[0]                               # wq*wk folded at init
    wv = attw_ref[1]
    q = wqk * x_tok
    scores = q[:, :, None] * x_tok[:, None, :]      # (B, W, W)
    m = jnp.max(scores, axis=-1, keepdims=True)
    e = jnp.exp(scores - m)
    denom = jnp.sum(e, axis=-1, keepdims=True)
    p = e * pl.reciprocal(denom, approx=True)       # EUP reciprocal (otherwise-idle slot)
    v = wv * x_tok
    att = jnp.sum(p * v[:, None, :], axis=-1)       # (B, W)

    # gen: 3x (Linear -> GELU) -> Linear, weights lane-sliced from one slab
    wg = w_gen_ref[...]                             # (W, 4W)
    r = _gelu(jnp.dot(att, wg[:, 0:W], preferred_element_type=jnp.float32) + bs[3:4, :W])
    r = _gelu(jnp.dot(r, wg[:, W:2 * W], preferred_element_type=jnp.float32) + bs[4:5, :W])
    r = _gelu(jnp.dot(r, wg[:, 2 * W:3 * W], preferred_element_type=jnp.float32) + bs[5:6, :W])
    out_ref[...] = jnp.dot(r, wg[:, 3 * W:4 * W],
                           preferred_element_type=jnp.float32) + bs[6:7, :W]


def pallas_seq2seq_head(attw2, kl_slab, vec, w_head, w_gen, b_slab, window):
    B = vec.shape[0]
    W = window
    H = vec.shape[1] - 2 * W
    DKL = kl_slab.shape[-1]
    vmem = pl.BlockSpec(memory_space=pltpu.MemorySpace.VMEM)
    smem = pl.BlockSpec(memory_space=pltpu.MemorySpace.SMEM)

    # advisory cost estimate so XLA schedules the surrounding glue sensibly
    flops = int(2 * B * H * 2 * W                 # fused layer 1
                + 2 * 2 * B * (2 * W) * (2 * W)   # two block-diag layers
                + 4 * 2 * B * W * W               # gen MLP
                + 4 * B * W * W                   # attention scores / softmax / sum
                + 12 * 4 * B * DKL)               # KL elementwise
    transcendentals = int(3 * B * 2 * W           # layer-1/branch GELU + softplus
                          + 3 * B * W             # gen GELU
                          + B * W * W + B * W     # softmax exp + reciprocal
                          + B * DKL)              # KL log
    bytes_accessed = int(4 * (attw2.size + kl_slab.size + vec.size + w_head.size
                              + w_gen.size + b_slab.size + B * W + 1))

    result, kl = pl.pallas_call(
        _fused_kernel,
        out_shape=(jax.ShapeDtypeStruct((B, W), jnp.float32),
                   jax.ShapeDtypeStruct((1, 1), jnp.float32)),
        in_specs=[smem, vmem, vmem, vmem, vmem, vmem],
        out_specs=(vmem, smem),
        cost_estimate=pl.CostEstimate(flops=flops,
                                      transcendentals=transcendentals,
                                      bytes_accessed=bytes_accessed),
    )(attw2, kl_slab, vec, w_head, w_gen, b_slab)
    return result, kl[0, 0]


# --------------------------------------------------------------------------
# deterministic parameter init (PyTorch-Linear-style uniform), pre-packed
# --------------------------------------------------------------------------
def _linear_init(key, fan_in, fan_out):
    kw, kb = jax.random.split(key)
    bound = 1.0 / math.sqrt(fan_in)
    w = jax.random.uniform(kw, (fan_in, fan_out), jnp.float32, -bound, bound)
    b = jax.random.uniform(kb, (1, fan_out), jnp.float32, -bound, bound)
    return w, b


def init_params(key, D, Dy, L, H, W):
    ks = iter(jax.random.split(key, 24))
    p = {}
    # synthetic stand-ins for the externally-injected prior / post / shift / decoder
    p["Wp_mu"], p["bp_mu"] = _linear_init(next(ks), D, L)
    p["Wp_std"], p["bp_std"] = _linear_init(next(ks), D, L)
    p["Wq_mu"], p["bq_mu"] = _linear_init(next(ks), D + Dy, L)
    p["Wq_std"], p["bq_std"] = _linear_init(next(ks), D + Dy, L)
    p["Wsh"], p["bsh"] = _linear_init(next(ks), L, H)
    p["Wd_z"], p["bd"] = _linear_init(next(ks), L, H)
    p["Wd_h"], _ = _linear_init(next(ks), H, H)

    # module's own heads, packed once at init for the fused kernel
    wm1, bm1 = _linear_init(next(ks), H, W)     # dec_mean L1
    wm2, bm2 = _linear_init(next(ks), W, W)     # dec_mean L2
    wm3, bm3 = _linear_init(next(ks), W, W)     # dec_mean L3
    ws1, bs1 = _linear_init(next(ks), H, W)     # dec_std  L1
    ws2, bs2 = _linear_init(next(ks), W, W)     # dec_std  L2
    ws3, bs3 = _linear_init(next(ks), W, W)     # dec_std  L3
    gen = [_linear_init(next(ks), W, W) for _ in range(4)]

    W2 = 2 * W
    R = max(H, W2)
    zero = jnp.zeros((W, W), jnp.float32)
    w1 = jnp.concatenate([wm1, ws1], axis=1)                  # (H, 2W)
    wbd2 = jnp.block([[wm2, zero], [zero, ws2]])              # (2W, 2W) block-diag
    wbd3 = jnp.block([[wm3, zero], [zero, ws3]])              # (2W, 2W) block-diag

    w_head = jnp.zeros((R, 3 * W2), jnp.float32)              # one lane-dense slab
    w_head = w_head.at[:H, 0:W2].set(w1)
    w_head = w_head.at[:W2, W2:2 * W2].set(wbd2)
    w_head = w_head.at[:W2, 2 * W2:3 * W2].set(wbd3)
    p["w_head"] = w_head

    p["w_gen"] = jnp.concatenate([w for (w, _) in gen], axis=1)   # (W, 4W)

    b_slab = jnp.zeros((8, W2), jnp.float32)                  # one (8,2W) bias tile
    b_slab = b_slab.at[0, :].set(jnp.concatenate([bm1[0], bs1[0]]))
    b_slab = b_slab.at[1, :].set(jnp.concatenate([bm2[0], bs2[0]]))
    b_slab = b_slab.at[2, :].set(jnp.concatenate([bm3[0], bs3[0]]))
    for i, (_, bb) in enumerate(gen):
        b_slab = b_slab.at[3 + i, :W].set(bb[0])
    p["b_slab"] = b_slab

    # SelfAttention(1,1,1): scalar projection weights; fold wq*wk at init
    attw = jax.random.uniform(next(ks), (3,), jnp.float32, -1.0, 1.0)
    p["attw2"] = jnp.stack([attw[0] * attw[1], attw[2]])
    return p


# --------------------------------------------------------------------------
# full forward (glue in plain JAX, hot path in one Pallas kernel)
# --------------------------------------------------------------------------
def seq2seq_forward(params, x_data, y, noise_key, N, window):
    B, T, D = x_data.shape

    # prior(x_data) -> history_z, prior (mu, std)       [synthetic external module]
    mu_p = x_data @ params["Wp_mu"] + params["bp_mu"]
    std_p = jax.nn.softplus(x_data @ params["Wp_std"] + params["bp_std"]) + 1e-3
    history_z = mu_p                                            # (B, T, L)

    # post(x_data, y) -> posterior (mu, std)             [synthetic external module]
    xy = jnp.concatenate([x_data, y], axis=-1)
    mu_q = xy @ params["Wq_mu"] + params["bq_mu"]
    std_q = jax.nn.softplus(xy @ params["Wq_std"] + params["bq_std"]) + 1e-3

    # KL operands as one (4B, T*L) slab -> exactly one native (8,128) f32 tile
    kl_slab = jnp.concatenate(
        [a.reshape(B, -1) for a in (mu_p, std_p, mu_q, std_q)], axis=0
    ).astype(jnp.float32)

    # hidden = shift(history_z)                          [synthetic external module]
    hidden = jnp.tanh(jnp.mean(history_z, axis=1) @ params["Wsh"] + params["bsh"])

    # Z = decoder(history_z[:, -1, :], hidden)           [synthetic external module]
    Z = jnp.tanh(history_z[:, -1, :] @ params["Wd_z"]
                 + hidden @ params["Wd_h"] + params["bd"])      # (B, H)

    # N reparameterization draws; (1/N)*sum(mu+std*eps_i) == mu + std*mean(eps)
    eps = jax.random.normal(noise_key, (N, B, window), jnp.float32)
    eps_mean = jnp.mean(eps, axis=0)                            # (B, window)

    # utils.PositionalEncoding(d_model=1, max_len=window): pe[pos] = sin(pos)
    pe = jnp.sin(jnp.arange(window, dtype=jnp.float32))[None, :]
    pe_b = jnp.broadcast_to(pe, (B, window))

    # pack z / eps_mean / pe into one vector slab (single DMA/ref)
    vec = jnp.concatenate([Z.astype(jnp.float32), eps_mean, pe_b], axis=1)

    # fused KL + dec heads + reparam + PE + self-attn + gen        [Pallas]
    result, kl = pallas_seq2seq_head(
        params["attw2"], kl_slab, vec,
        params["w_head"], params["w_gen"], params["b_slab"], window)
    return result, kl


# --------------------------------------------------------------------------
if __name__ == "__main__":
    B, T, D, Dy = 2, 8, 4, 2          # batch, seq len, x feature dim, y feature dim
    L, H, W, N = 16, 32, 16, 4        # latent_dim, decoder.hid_dim, window, N

    key = jax.random.PRNGKey(0)
    kp, kx, ky, ke = jax.random.split(key, 4)

    params = init_params(kp, D, Dy, L, H, W)
    x_data = jax.random.normal(kx, (B, T, D), jnp.float32)
    y = jax.random.normal(ky, (B, T, Dy), jnp.float32)

    fwd = jax.jit(seq2seq_forward, static_argnums=(4, 5))
    result, kl = fwd(params, x_data, y, ke, N, W)
    jax.block_until_ready((result, kl))

    assert result.shape == (B, W)
    assert kl.shape == ()
    assert bool(jnp.all(jnp.isfinite(result))) and bool(jnp.isfinite(kl))
    print("KERNEL_OK")
</pallas_src>

<mosaic_0001>
module attributes {stable_mosaic.version = 11 : i64} {
  func.func @_fused_kernel(%arg0: memref<2xf32, #tpu.memory_space<smem>>, %arg1: memref<8x128xf32, #tpu.memory_space<vmem>>, %arg2: memref<2x64xf32, #tpu.memory_space<vmem>>, %arg3: memref<32x96xf32, #tpu.memory_space<vmem>>, %arg4: memref<16x64xf32, #tpu.memory_space<vmem>>, %arg5: memref<8x32xf32, #tpu.memory_space<vmem>>, %arg6: memref<2x16xf32, #tpu.memory_space<vmem>>, %arg7: memref<1x1xf32, #tpu.memory_space<smem>>) attributes {dimension_semantics = [], scalar_prefetch = 0 : i64, scratch_operands = 0 : i64, tpu.core_type = #tpu.core_type<tc>} {
    %c0 = arith.constant 0 : index
    %c0_0 = arith.constant 0 : index
    %0 = vector.load %arg1[%c0, %c0_0] : memref<8x128xf32, #tpu.memory_space<vmem>>, vector<8x128xf32>
    %1 = vector.extract_strided_slice %0 {offsets = [0, 0], sizes = [2, 128], strides = [1, 1]} : vector<8x128xf32> to vector<2x128xf32>
    %2 = vector.extract_strided_slice %0 {offsets = [2, 0], sizes = [2, 128], strides = [1, 1]} : vector<8x128xf32> to vector<2x128xf32>
    %3 = vector.extract_strided_slice %0 {offsets = [4, 0], sizes = [2, 128], strides = [1, 1]} : vector<8x128xf32> to vector<2x128xf32>
    %4 = vector.extract_strided_slice %0 {offsets = [6, 0], sizes = [2, 128], strides = [1, 1]} : vector<8x128xf32> to vector<2x128xf32>
    %5 = arith.mulf %2, %2 : vector<2x128xf32>
    %6 = arith.mulf %4, %4 : vector<2x128xf32>
    %7 = arith.subf %3, %1 : vector<2x128xf32>
    %8 = arith.divf %2, %4 : vector<2x128xf32>
    %9 = math.log %8 : vector<2x128xf32>
    %10 = arith.mulf %7, %7 : vector<2x128xf32>
    %11 = arith.addf %6, %10 : vector<2x128xf32>
    %cst = arith.constant 5.000000e-01 : f32
    %12 = vector.broadcast %cst : f32 to vector<2x128xf32>
    %13 = arith.mulf %12, %11 : vector<2x128xf32>
    %14 = arith.divf %13, %5 : vector<2x128xf32>
    %15 = arith.addf %9, %14 : vector<2x128xf32>
    %cst_1 = arith.constant 5.000000e-01 : f32
    %16 = vector.broadcast %cst_1 : f32 to vector<2x128xf32>
    %17 = arith.subf %15, %16 : vector<2x128xf32>
    %18 = vector.shape_cast %17 : vector<2x128xf32> to vector<1x2x128xf32>
    %cst_2 = arith.constant dense<0.000000e+00> : vector<1xf32>
    %19 = vector.multi_reduction <add>, %18, %cst_2 [1, 2] : vector<1x2x128xf32> to vector<1xf32>
    %20 = vector.shape_cast %19 : vector<1xf32> to vector<1x1x1xf32>
    %21 = vector.extract %20[0, 0, 0] : f32 from vector<1x1x1xf32>
    %cst_3 = arith.constant 5.000000e-01 : f32
    %22 = arith.mulf %21, %cst_3 : f32
    %c0_4 = arith.constant 0 : index
    %c0_5 = arith.constant 0 : index
    %23 = memref.load %arg7[%c0_4, %c0_5] : memref<1x1xf32, #tpu.memory_space<smem>>
    memref.store %22, %arg7[%c0_4, %c0_5] : memref<1x1xf32, #tpu.memory_space<smem>>
    %c0_6 = arith.constant 0 : index
    %c0_7 = arith.constant 0 : index
    %24 = vector.load %arg2[%c0_6, %c0_7] : memref<2x64xf32, #tpu.memory_space<vmem>>, vector<2x64xf32>
    %25 = vector.extract_strided_slice %24 {offsets = [0, 0], sizes = [2, 32], strides = [1, 1]} : vector<2x64xf32> to vector<2x32xf32>
    %26 = vector.extract_strided_slice %24 {offsets = [0, 32], sizes = [2, 16], strides = [1, 1]} : vector<2x64xf32> to vector<2x16xf32>
    %27 = vector.extract_strided_slice %24 {offsets = [0, 48], sizes = [2, 16], strides = [1, 1]} : vector<2x64xf32> to vector<2x16xf32>
    %c0_8 = arith.constant 0 : index
    %c0_9 = arith.constant 0 : index
    %28 = vector.load %arg3[%c0_8, %c0_9] : memref<32x96xf32, #tpu.memory_space<vmem>>, vector<32x96xf32>
    %c0_10 = arith.constant 0 : index
    %c0_11 = arith.constant 0 : index
    %29 = vector.load %arg5[%c0_10, %c0_11] : memref<8x32xf32, #tpu.memory_space<vmem>>, vector<8x32xf32>
    %30 = vector.extract_strided_slice %28 {offsets = [0, 0], sizes = [32, 32], strides = [1, 1]} : vector<32x96xf32> to vector<32x32xf32>
    %cst_12 = arith.constant dense<0.000000e+00> : vector<2x32xf32>
    %31 = tpu.matmul %25, %30, %cst_12 {dimension_numbers = #tpu.dot_dimension_numbers<[1], [0], [0], [1], [0, 0, 1, 1], [], []>} : vector<2x32xf32>, vector<32x32xf32>, vector<2x32xf32> -> vector<2x32xf32>
    %32 = vector.extract_strided_slice %29 {offsets = [0, 0], sizes = [1, 32], strides = [1, 1]} : vector<8x32xf32> to vector<1x32xf32>
    %33 = vector.broadcast %32 : vector<1x32xf32> to vector<2x32xf32>
    %34 = arith.addf %31, %33 : vector<2x32xf32>
    %35 = arith.mulf %34, %34 : vector<2x32xf32>
    %36 = arith.mulf %34, %35 : vector<2x32xf32>
    %cst_13 = arith.constant 4.471500e-02 : f32
    %37 = vector.broadcast %cst_13 : f32 to vector<2x32xf32>
    %38 = arith.mulf %37, %36 : vector<2x32xf32>
    %39 = arith.addf %34, %38 : vector<2x32xf32>
    %cst_14 = arith.constant 0.797884583 : f32
    %40 = vector.broadcast %cst_14 : f32 to vector<2x32xf32>
    %41 = arith.mulf %40, %39 : vector<2x32xf32>
    %42 = math.tanh %41 : vector<2x32xf32>
    %cst_15 = arith.constant 1.000000e+00 : f32
    %43 = vector.broadcast %cst_15 : f32 to vector<2x32xf32>
    %44 = arith.addf %43, %42 : vector<2x32xf32>
    %cst_16 = arith.constant 5.000000e-01 : f32
    %45 = vector.broadcast %cst_16 : f32 to vector<2x32xf32>
    %46 = arith.mulf %45, %44 : vector<2x32xf32>
    %47 = arith.mulf %34, %46 : vector<2x32xf32>
    %48 = vector.extract_strided_slice %28 {offsets = [0, 32], sizes = [32, 32], strides = [1, 1]} : vector<32x96xf32> to vector<32x32xf32>
    %cst_17 = arith.constant dense<0.000000e+00> : vector<2x32xf32>
    %49 = tpu.matmul %47, %48, %cst_17 {dimension_numbers = #tpu.dot_dimension_numbers<[1], [0], [0], [1], [0, 0, 1, 1], [], []>} : vector<2x32xf32>, vector<32x32xf32>, vector<2x32xf32> -> vector<2x32xf32>
    %50 = vector.extract_strided_slice %29 {offsets = [1, 0], sizes = [1, 32], strides = [1, 1]} : vector<8x32xf32> to vector<1x32xf32>
    %51 = vector.broadcast %50 : vector<1x32xf32> to vector<2x32xf32>
    %52 = arith.addf %49, %51 : vector<2x32xf32>
    %53 = tpu.iota {dimensions = array<i32: 1>} : vector<2x32xi32>
    %c16_i32 = arith.constant 16 : i32
    %54 = vector.broadcast %c16_i32 : i32 to vector<2x32xi32>
    %55 = arith.cmpi slt, %53, %54 : vector<2x32xi32>
    %56 = arith.mulf %52, %52 : vector<2x32xf32>
    %57 = arith.mulf %52, %56 : vector<2x32xf32>
    %cst_18 = arith.constant 4.471500e-02 : f32
    %58 = vector.broadcast %cst_18 : f32 to vector<2x32xf32>
    %59 = arith.mulf %58, %57 : vector<2x32xf32>
    %60 = arith.addf %52, %59 : vector<2x32xf32>
    %cst_19 = arith.constant 0.797884583 : f32
    %61 = vector.broadcast %cst_19 : f32 to vector<2x32xf32>
    %62 = arith.mulf %61, %60 : vector<2x32xf32>
    %63 = math.tanh %62 : vector<2x32xf32>
    %cst_20 = arith.constant 1.000000e+00 : f32
    %64 = vector.broadcast %cst_20 : f32 to vector<2x32xf32>
    %65 = arith.addf %64, %63 : vector<2x32xf32>
    %cst_21 = arith.constant 5.000000e-01 : f32
    %66 = vector.broadcast %cst_21 : f32 to vector<2x32xf32>
    %67 = arith.mulf %66, %65 : vector<2x32xf32>
    %68 = arith.mulf %52, %67 : vector<2x32xf32>
    %cst_22 = arith.constant 0.000000e+00 : f32
    %69 = vector.broadcast %cst_22 : f32 to vector<2x32xf32>
    %70 = arith.maximumf %52, %69 : vector<2x32xf32>
    %71 = math.absf %52 : vector<2x32xf32>
    %cst_23 = arith.constant 0.000000e+00 : f32
    %72 = vector.broadcast %cst_23 : f32 to vector<2x32xf32>
    %73 = arith.subf %72, %71 : vector<2x32xf32>
    %74 = math.exp %73 : vector<2x32xf32>
    %cst_24 = arith.constant 1.000000e+00 : f32
    %75 = vector.broadcast %cst_24 : f32 to vector<2x32xf32>
    %76 = arith.addf %75, %74 : vector<2x32xf32>
    %77 = math.log %76 : vector<2x32xf32>
    %78 = arith.addf %70, %77 : vector<2x32xf32>
    %79 = arith.select %55, %68, %78 : vector<2x32xi1>, vector<2x32xf32>
    %80 = vector.extract_strided_slice %28 {offsets = [0, 64], sizes = [32, 32], strides = [1, 1]} : vector<32x96xf32> to vector<32x32xf32>
    %cst_25 = arith.constant dense<0.000000e+00> : vector<2x32xf32>
    %81 = tpu.matmul %79, %80, %cst_25 {dimension_numbers = #tpu.dot_dimension_numbers<[1], [0], [0], [1], [0, 0, 1, 1], [], []>} : vector<2x32xf32>, vector<32x32xf32>, vector<2x32xf32> -> vector<2x32xf32>
    %82 = vector.extract_strided_slice %29 {offsets = [2, 0], sizes = [1, 32], strides = [1, 1]} : vector<8x32xf32> to vector<1x32xf32>
    %83 = vector.broadcast %82 : vector<1x32xf32> to vector<2x32xf32>
    %84 = arith.addf %81, %83 : vector<2x32xf32>
    %85 = vector.extract_strided_slice %84 {offsets = [0, 0], sizes = [2, 16], strides = [1, 1]} : vector<2x32xf32> to vector<2x16xf32>
    %86 = vector.extract_strided_slice %84 {offsets = [0, 16], sizes = [2, 16], strides = [1, 1]} : vector<2x32xf32> to vector<2x16xf32>
    %87 = arith.mulf %86, %26 : vector<2x16xf32>
    %88 = arith.addf %85, %87 : vector<2x16xf32>
    %cst_26 = arith.constant 1.000000e+00 : f32
    %89 = vector.broadcast %cst_26 : f32 to vector<2x16xf32>
    %90 = arith.addf %89, %27 : vector<2x16xf32>
    %91 = arith.mulf %88, %90 : vector<2x16xf32>
    %c0_27 = arith.constant 0 : index
    %92 = memref.load %arg0[%c0_27] : memref<2xf32, #tpu.memory_space<smem>>
    %c1 = arith.constant 1 : index
    %93 = memref.load %arg0[%c1] : memref<2xf32, #tpu.memory_space<smem>>
    %94 = vector.broadcast %92 : f32 to vector<2x16xf32>
    %95 = arith.mulf %94, %91 : vector<2x16xf32>
    %96 = vector.shape_cast %95 : vector<2x16xf32> to vector<2x16x1xf32>
    %97 = vector.shape_cast %91 : vector<2x16xf32> to vector<2x1x16xf32>
    %98 = vector.broadcast %96 : vector<2x16x1xf32> to vector<2x16x16xf32>
    %99 = vector.broadcast %97 : vector<2x1x16xf32> to vector<2x16x16xf32>
    %100 = arith.mulf %98, %99 : vector<2x16x16xf32>
    %cst_28 = arith.constant dense<0xFF800000> : vector<2x16xf32>
    %101 = vector.multi_reduction <maximumf>, %100, %cst_28 [2] : vector<2x16x16xf32> to vector<2x16xf32>
    %102 = vector.shape_cast %101 : vector<2x16xf32> to vector<2x16x1xf32>
    %103 = vector.broadcast %102 : vector<2x16x1xf32> to vector<2x16x16xf32>
    %104 = arith.subf %100, %103 : vector<2x16x16xf32>
    %105 = math.exp %104 : vector<2x16x16xf32>
    %cst_29 = arith.constant dense<0.000000e+00> : vector<2x16xf32>
    %106 = vector.multi_reduction <add>, %105, %cst_29 [2] : vector<2x16x16xf32> to vector<2x16xf32>
    %107 = vector.shape_cast %106 : vector<2x16xf32> to vector<2x16x1xf32>
    %108 = tpu.reciprocal %107 {approx = true} : vector<2x16x1xf32> -> vector<2x16x1xf32>
    %109 = vector.broadcast %108 : vector<2x16x1xf32> to vector<2x16x16xf32>
    %110 = arith.mulf %105, %109 : vector<2x16x16xf32>
    %111 = vector.broadcast %93 : f32 to vector<2x16xf32>
    %112 = arith.mulf %111, %91 : vector<2x16xf32>
    %113 = vector.shape_cast %112 : vector<2x16xf32> to vector<2x1x16xf32>
    %114 = vector.broadcast %113 : vector<2x1x16xf32> to vector<2x16x16xf32>
    %115 = arith.mulf %110, %114 : vector<2x16x16xf32>
    %cst_30 = arith.constant dense<0.000000e+00> : vector<2x16xf32>
    %116 = vector.multi_reduction <add>, %115, %cst_30 [2] : vector<2x16x16xf32> to vector<2x16xf32>
    %c0_31 = arith.constant 0 : index
    %c0_32 = arith.constant 0 : index
    %117 = vector.load %arg4[%c0_31, %c0_32] : memref<16x64xf32, #tpu.memory_space<vmem>>, vector<16x64xf32>
    %118 = vector.extract_strided_slice %117 {offsets = [0, 0], sizes = [16, 16], strides = [1, 1]} : vector<16x64xf32> to vector<16x16xf32>
    %cst_33 = arith.constant dense<0.000000e+00> : vector<2x16xf32>
    %119 = tpu.matmul %116, %118, %cst_33 {dimension_numbers = #tpu.dot_dimension_numbers<[1], [0], [0], [1], [0, 0, 1, 1], [], []>} : vector<2x16xf32>, vector<16x16xf32>, vector<2x16xf32> -> vector<2x16xf32>
    %120 = vector.extract_strided_slice %29 {offsets = [3, 0], sizes = [1, 16], strides = [1, 1]} : vector<8x32xf32> to vector<1x16xf32>
    %121 = vector.broadcast %120 : vector<1x16xf32> to vector<2x16xf32>
    %122 = arith.addf %119, %121 : vector<2x16xf32>
    %123 = arith.mulf %122, %122 : vector<2x16xf32>
    %124 = arith.mulf %122, %123 : vector<2x16xf32>
    %cst_34 = arith.constant 4.471500e-02 : f32
    %125 = vector.broadcast %cst_34 : f32 to vector<2x16xf32>
    %126 = arith.mulf %125, %124 : vector<2x16xf32>
    %127 = arith.addf %122, %126 : vector<2x16xf32>
    %cst_35 = arith.constant 0.797884583 : f32
    %128 = vector.broadcast %cst_35 : f32 to vector<2x16xf32>
    %129 = arith.mulf %128, %127 : vector<2x16xf32>
    %130 = math.tanh %129 : vector<2x16xf32>
    %cst_36 = arith.constant 1.000000e+00 : f32
    %131 = vector.broadcast %cst_36 : f32 to vector<2x16xf32>
    %132 = arith.addf %131, %130 : vector<2x16xf32>
    %cst_37 = arith.constant 5.000000e-01 : f32
    %133 = vector.broadcast %cst_37 : f32 to vector<2x16xf32>
    %134 = arith.mulf %133, %132 : vector<2x16xf32>
    %135 = arith.mulf %122, %134 : vector<2x16xf32>
    %136 = vector.extract_strided_slice %117 {offsets = [0, 16], sizes = [16, 16], strides = [1, 1]} : vector<16x64xf32> to vector<16x16xf32>
    %cst_38 = arith.constant dense<0.000000e+00> : vector<2x16xf32>
    %137 = tpu.matmul %135, %136, %cst_38 {dimension_numbers = #tpu.dot_dimension_numbers<[1], [0], [0], [1], [0, 0, 1, 1], [], []>} : vector<2x16xf32>, vector<16x16xf32>, vector<2x16xf32> -> vector<2x16xf32>
    %138 = vector.extract_strided_slice %29 {offsets = [4, 0], sizes = [1, 16], strides = [1, 1]} : vector<8x32xf32> to vector<1x16xf32>
    %139 = vector.broadcast %138 : vector<1x16xf32> to vector<2x16xf32>
    %140 = arith.addf %137, %139 : vector<2x16xf32>
    %141 = arith.mulf %140, %140 : vector<2x16xf32>
    %142 = arith.mulf %140, %141 : vector<2x16xf32>
    %cst_39 = arith.constant 4.471500e-02 : f32
    %143 = vector.broadcast %cst_39 : f32 to vector<2x16xf32>
    %144 = arith.mulf %143, %142 : vector<2x16xf32>
    %145 = arith.addf %140, %144 : vector<2x16xf32>
    %cst_40 = arith.constant 0.797884583 : f32
    %146 = vector.broadcast %cst_40 : f32 to vector<2x16xf32>
    %147 = arith.mulf %146, %145 : vector<2x16xf32>
    %148 = math.tanh %147 : vector<2x16xf32>
    %cst_41 = arith.constant 1.000000e+00 : f32
    %149 = vector.broadcast %cst_41 : f32 to vector<2x16xf32>
    %150 = arith.addf %149, %148 : vector<2x16xf32>
    %cst_42 = arith.constant 5.000000e-01 : f32
    %151 = vector.broadcast %cst_42 : f32 to vector<2x16xf32>
    %152 = arith.mulf %151, %150 : vector<2x16xf32>
    %153 = arith.mulf %140, %152 : vector<2x16xf32>
    %154 = vector.extract_strided_slice %117 {offsets = [0, 32], sizes = [16, 16], strides = [1, 1]} : vector<16x64xf32> to vector<16x16xf32>
    %cst_43 = arith.constant dense<0.000000e+00> : vector<2x16xf32>
    %155 = tpu.matmul %153, %154, %cst_43 {dimension_numbers = #tpu.dot_dimension_numbers<[1], [0], [0], [1], [0, 0, 1, 1], [], []>} : vector<2x16xf32>, vector<16x16xf32>, vector<2x16xf32> -> vector<2x16xf32>
    %156 = vector.extract_strided_slice %29 {offsets = [5, 0], sizes = [1, 16], strides = [1, 1]} : vector<8x32xf32> to vector<1x16xf32>
    %157 = vector.broadcast %156 : vector<1x16xf32> to vector<2x16xf32>
    %158 = arith.addf %155, %157 : vector<2x16xf32>
    %159 = arith.mulf %158, %158 : vector<2x16xf32>
    %160 = arith.mulf %158, %159 : vector<2x16xf32>
    %cst_44 = arith.constant 4.471500e-02 : f32
    %161 = vector.broadcast %cst_44 : f32 to vector<2x16xf32>
    %162 = arith.mulf %161, %160 : vector<2x16xf32>
    %163 = arith.addf %158, %162 : vector<2x16xf32>
    %cst_45 = arith.constant 0.797884583 : f32
    %164 = vector.broadcast %cst_45 : f32 to vector<2x16xf32>
    %165 = arith.mulf %164, %163 : vector<2x16xf32>
    %166 = math.tanh %165 : vector<2x16xf32>
    %cst_46 = arith.constant 1.000000e+00 : f32
    %167 = vector.broadcast %cst_46 : f32 to vector<2x16xf32>
    %168 = arith.addf %167, %166 : vector<2x16xf32>
    %cst_47 = arith.constant 5.000000e-01 : f32
    %169 = vector.broadcast %cst_47 : f32 to vector<2x16xf32>
    %170 = arith.mulf %169, %168 : vector<2x16xf32>
    %171 = arith.mulf %158, %170 : vector<2x16xf32>
    %172 = vector.extract_strided_slice %117 {offsets = [0, 48], sizes = [16, 16], strides = [1, 1]} : vector<16x64xf32> to vector<16x16xf32>
    %cst_48 = arith.constant dense<0.000000e+00> : vector<2x16xf32>
    %173 = tpu.matmul %171, %172, %cst_48 {dimension_numbers = #tpu.dot_dimension_numbers<[1], [0], [0], [1], [0, 0, 1, 1], [], []>} : vector<2x16xf32>, vector<16x16xf32>, vector<2x16xf32> -> vector<2x16xf32>
    %174 = vector.extract_strided_slice %29 {offsets = [6, 0], sizes = [1, 16], strides = [1, 1]} : vector<8x32xf32> to vector<1x16xf32>
    %175 = vector.broadcast %174 : vector<1x16xf32> to vector<2x16xf32>
    %176 = arith.addf %173, %175 : vector<2x16xf32>
    %c0_49 = arith.constant 0 : index
    %c0_50 = arith.constant 0 : index
    %177 = vector.load %arg6[%c0_49, %c0_50] : memref<2x16xf32, #tpu.memory_space<vmem>>, vector<2x16xf32>
    tpu.vector_store %arg6[%c0_49, %c0_50], %176 {strides = array<i32>} : memref<2x16xf32, #tpu.memory_space<vmem>>, vector<2x16xf32>,
    return
  }
}

</mosaic_0001>

<bundles_post_ra>
// kernel: seq2seq_forward.1
= control target key start
LH: loop header
LB: loop body
LE: loop exit
PB: predicated region body
PF: predicated region fallthrough
CT: control target
= control target key end

     0   :  { %13 = vsyncpa [#allocation5], 0  ;;  %s1367_s0 = inlined_call_operand.vmem [shape: f32[2], index: 0, kind: input, shape index: {}]   ;;  %s1368_s1 = inlined_call_operand.vmem [shape: f32[8,128], index: 1, kind: input, shape index: {}]   ;;  %s1369_s2 = inlined_call_operand.vmem [shape: f32[2,64], index: 2, kind: input, shape index: {}]   ;;  %s1370_s3 = inlined_call_operand.vmem [shape: f32[32,96], index: 3, kind: input, shape index: {}]   ;;  %s1371_s4 = inlined_call_operand.vmem [shape: f32[16,64], index: 4, kind: input, shape index: {}]   ;;  %s1372_s5 = inlined_call_operand.vmem [shape: f32[8,32], index: 5, kind: input, shape index: {}]   ;;  %s1373_s6 = inlined_call_operand.hbm [shape: f32[2,16], index: 6, kind: output, shape index: {0}]   ;;  %s1374_s7 = inlined_call_operand.hbm [shape: f32[1,1], index: 7, kind: output, shape index: {1}]  }
   0x1   :  { %14 = vsyncpa [#allocation3], 0 }
   0x2   :  { %15 = vsyncpa [#allocation4], 0  ;;  %s22_s26 = sshll.u32 %s1367_s0, 4  ;;  %s23_s26 = int_to_ptr.vmem [resolvable:$true] %s22_s26 }
   0x3   :  { %s1111_s27 = scalar_lea.vmem %s23_s26, 16  ;;  %p1116_p1 = scmp.lt.s32.totalorder %s23_s26, %s23_s26 }
   0x4   :  { %p1112_p0 = scmp.ne.s32.totalorder %s23_s26, %s1111_s27  ;;  %p1117_p2 = scmp.lt.s32.totalorder %s1111_s27, %s1111_s27 }
   0x6   :  { %p1118_p3 = por %p1117_p2, %p1116_p1 }
   0x8   :  { %p1119_p4 = pnand %p1118_p3, %p1112_p0 }
   0xa   :  { %1122 = shalt.err (!%p1119_p4)
}
   0xb   :  { %s1157_s28 = smov [#allocation2]  }
   0xc   :  { %25 = dma.vmem_to_smem %s23_s26, 16, %s1157_s28, [#allocation5]  }
   0xd   :  { %1151 = dma.done.wait [#allocation5], 16  }
   0xe   :  { %1152 = vsyncadd [#allocation5], 4294967280 }
   0xf   :  { %39 = sfence }
  0x10   :  { %v87_v0 = vld [vmem:[%s1370_s3 + $0x18] sm:$0xff]  ;;  %v1158_v1 = vmov 0.0   ;;  %v86_v2 = vld [vmem:[%s1370_s3 + $0x10] sm:$0xff]  ;;  %vm1159_vm0 = vmmov 0   ;;  %v85_v3 = vld [vmem:[%s1370_s3 + $0x8] sm:$0xff]  ;;  %s1160_s11 = smov 96   ;;  %v89_v10 = vlaneseq }
  0x11   :  { %1002 = vmatprep.subr.mxu0 %v1158_v1  ;;  %1010 = vmatprep.mubr.msk.f32.mxu0 %vm1159_vm0, %v1158_v1  ;;  %v84_v4 = vld [vmem:[%s1370_s3] sm:$0xff]  ;;  %vm93_vm1 = vcmask 261120   ;;  %s1161_s3 = smov 64   ;;  %s1163_s17 = smov 80   ;;  %vm458_vm3 = vcmask 130048   ;;  %vm573_vm4 = vcmask 130112  }
  0x12   :  { %1003 = vmatpush3.msra.mxu0 %v87_v0  ;;  %190 = vrot.lane.b32.xlu0 %v87_v0, %s1160_s11  ;;  %v1235_v5 = vld [vmem:[%s1369_s2] sm:$0x3]  ;;  %v1249_v11 = vshrl.u32 %v89_v10, 7  ;;  %v1272_v48 = vand.u32 127, %v89_v10  ;;  %s970_s18 = sld [smem:[#allocation2 + $0x1]]  ;;  %vm584_vm5 = vcmask 1041409  }
  0x13   :  { %1004 = vmatprep.subr.mxu0 %v1158_v1  ;;  %186 = vrot.lane.b32.xlu1 %v85_v3, %s1160_s11  ;;  %v1257_v13 = vld [vmem:[%s1372_s5] sm:$0xff]  ;;  %s1162_s5 = smov 112   ;;  %v389_v56 = vadd.f32 1.0, %v1235_v5  ;;  %s395_s19 = sld [smem:[#allocation2]]  ;;  %vm69_vm6 = vcmask 1041408   ;;  %vm936_vm7 = vcmask 123904  }
  0x14   :  { %1005 = vmatpush3.msra.mxu0 %v86_v2  ;;  %1013 = vmatprep.subr.mxu1 %v1158_v1  ;;  %v1252_v12 = vsub.s32 0, %v1249_v11  ;;  %v178_v31 = vsub.s32 1, %v1249_v11  ;;  %vm271_vm2 = vcmp.lt.s32.totalorder %v1272_v48, 16  ;;  %v293_v57 = vsub.s32 2, %v1249_v11  ;;  %s1165_s26 = smov [#allocation7]   ;;  %s1166_s29 = smov [#allocation6]  }
  0x15   :  { %1006 = vmatprep.subr.mxu0 %v1158_v1  ;;  %1021 = vmatprep.mubr.msk.f32.mxu1 %vm1159_vm0, %v1158_v1  ;;  %s944_s30 = sshll.u32 %s1166_s29, 4  ;;  %s945_s30 = int_to_ptr.vmem [resolvable:$true] %s944_s30 }
  0x16   :  { %1007 = vmatpush3.msra.mxu0 %v85_v3  ;;  %188 = vrot.lane.b32.xlu0 %v86_v2, %s1160_s11  ;;  %v92_v14 = vrot.slane %v1257_v13, %v1252_v12  ;;  %v179_v32 = vrot.slane %v1257_v13, %v178_v31  ;;  %v294_v58 = vrot.slane %v1257_v13, %v293_v57  ;;  %s1131_s0 = scalar_lea.vmem %s945_s30, 32  ;;  %p1136_p6 = scmp.lt.s32.totalorder %s945_s30, %s945_s30 }
  0x17   :  { %1008 = vmatprep.subr.mxu0 %v1158_v1  ;;  %184 = vrot.lane.b32.xlu1 %v84_v4, %s1160_s11  ;;  %p1132_p5 = scmp.ne.s32.totalorder %s945_s30, %s1131_s0  ;;  %p1137_p7 = scmp.lt.s32.totalorder %s1131_s0, %s1131_s0 }
  0x18   :  { %1009 = vmatpush3.msra.mxu0 %v84_v4 }
  0x19   :  { %1011 = vmatmul.mubr.msk.f32.vlgmr.msra.gmra.mxu0 %vm93_vm1, %v1235_v5  ;;  %1024 = vmatprep.subr.mxu0 %v1158_v1  ;;  %p1138_p8 = por %p1137_p7, %p1136_p6 }
  0x1a   :  { %1032 = vmatprep.mubr.msk.f32.mxu0 %vm1159_vm0, %v1158_v1  ;;  %301 = vrot.lane.b32.xlu0 %v87_v0, %s1161_s3  ;;  %v1164_v0 = vmov 1966171168  }
  0x1b   :  { %299 = vrot.lane.b32.xlu1 %v86_v2, %s1161_s3  ;;  %v423_v2 = vunpack.c.l.s4 %v1164_v0  ;;  %p1139_p9 = pnand %p1138_p8, %p1132_p5 }
  0x1e   :  { %297 = vrot.lane.b32.xlu0 %v85_v3, %s1161_s3 }
  0x1f   :  { %295 = vrot.lane.b32.xlu1 %v84_v4, %s1161_s3 }
  0x22   :  { %380 = vrot.lane.b32.xlu0 %v1235_v5, %s1162_s5 }
  0x26   :  { %391 = vrot.lane.b32.xlu0 %v389_v56, %s1163_s17 }
  0x84   :  { %v191_v6 = vpop.permute.xlu0 %190 }
  0x85   :  { %1014 = vmatpush3.msra.mxu1 %v191_v6  ;;  %v187_v7 = vpop.permute.xlu1 %186  ;;  %v424_v6 = vunpack.c.0.s8 %v423_v2 }
  0x86   :  { %1015 = vmatprep.subr.mxu1 %v1158_v1 }
  0x87   :  { %v1284_v10 = vsub.s32 %v424_v6, %v1249_v11 }
  0x88   :  { %v189_v8 = vpop.permute.xlu0 %188 }
  0x89   :  { %1016 = vmatpush3.msra.mxu1 %v189_v8  ;;  %v185_v9 = vpop.permute.xlu1 %184  ;;  %v397_v8 = vstv %s395_s19 }
  0x8a   :  { %1017 = vmatprep.subr.mxu1 %v1158_v1 }
  0x8b   :  { %1018 = vmatpush3.msra.mxu1 %v187_v7  ;;  %v503_v7 = vstv %s970_s18 }
  0x8c   :  { %1019 = vmatprep.subr.mxu1 %v1158_v1  ;;  %v302_v27 = vpop.permute.xlu0 %301 }
  0x8d   :  { %1020 = vmatpush3.msra.mxu1 %v185_v9  ;;  %v300_v28 = vpop.permute.xlu1 %299  ;;  %1025 = vmatpush3.msra.mxu0 %v302_v27 }
  0x8e   :  { %1035 = vmatprep.subr.mxu1 %v1158_v1  ;;  %1026 = vmatprep.subr.mxu0 %v1158_v1 }
  0x8f   :  { %1027 = vmatpush3.msra.mxu0 %v300_v28 }
  0x90   :  { %v298_v29 = vpop.permute.xlu0 %297  ;;  %1028 = vmatprep.subr.mxu0 %v1158_v1 }
  0x91   :  { %v296_v30 = vpop.permute.xlu1 %295  ;;  %1029 = vmatpush3.msra.mxu0 %v298_v29 }
  0x92   :  { %1030 = vmatprep.subr.mxu0 %v1158_v1 }
  0x93   :  { %1031 = vmatpush3.msra.mxu0 %v296_v30 }
  0x94   :  { %1049 = vmatprep.subr.mxu0 %v1158_v1  ;;  %v381_v60 = vpop.permute.xlu0 %380 }
  0x98   :  { %v392_v4 = vpop.permute.xlu0 %391 }
  0xd9   :  { %v163_v15 = vpop.f32.mrf.mxu0 }
  0xda   :  { %v164_v16 = vadd.f32 %v163_v15, %v92_v14 }
  0xdb   :  { %v1012_v17 = vpop.f32.mrf.mxu0 }
  0xdc   :  { %v167_v18 = vmul.f32 %v164_v16, %v164_v16 }
  0xde   :  { %v168_v19 = vmul.f32 %v167_v18, %v164_v16 }
  0xe0   :  { %v169_v20 = vmul.f32 0.044715, %v168_v19 }
  0xe2   :  { %v170_v21 = vadd.f32 %v169_v20, %v164_v16 }
  0xe4   :  { %v171_v22 = vmul.f32 0.7978846, %v170_v21 }
  0xe6   :  { %1075 = vtanh.f32 %v171_v22 }
  0xf3   :  { %v1076_v23 = vpop.eup %1075 }
  0xf4   :  { %v173_v24 = vadd.f32 1.0, %v1076_v23 }
  0xf6   :  { %v174_v25 = vmul.f32 0.5, %v173_v24 }
  0xf8   :  { %v175_v26 = vmul.f32 %v174_v25, %v164_v16 }
  0xfa   :  { %1022 = vmatmul.mubr.msk.f32.vlgmr.msra.gmra.mxu1 %vm93_vm1, %v175_v26 }
  0xfb   :  { %1039 = vmatprep.mubr.msk.f32.mxu1 %vm1159_vm0, %v1158_v1 }
 0x1ba   :  { %v265_v33 = vpop.f32.mrf.mxu1 }
 0x1bb   :  { %v266_v34 = vadd.f32 %v265_v33, %v179_v32 }
 0x1bc   :  { %v1023_v35 = vpop.f32.mrf.mxu1 }
 0x1bd   :  { %v272_v36 = vmul.f32 %v266_v34, %v266_v34  ;;  %v282_v37 = vand.u32 2147483647, %v266_v34  ;;  %v281_v51 = vmax.f32 %v266_v34, 0.0 }
 0x1bf   :  { %v273_v38 = vmul.f32 %v272_v36, %v266_v34  ;;  %v283_v39 = vsub.f32 0.0, %v282_v37 }
 0x1c1   :  { %v274_v40 = vmul.f32 0.044715, %v273_v38  ;;  %v284_v41 = vmul.f32 1.442695, %v283_v39 }
 0x1c3   :  { %v275_v42 = vadd.f32 %v274_v40, %v266_v34  ;;  %1077 = vpow2.f32 %v284_v41 }
 0x1c5   :  { %v276_v43 = vmul.f32 0.7978846, %v275_v42 }
 0x1c7   :  { %1079 = vtanh.f32 %v276_v43 }
 0x1d0   :  { %v1078_v44 = vpop.eup %1077 }
 0x1d1   :  { %v286_v45 = vadd.f32 1.0, %v1078_v44 }
 0x1d3   :  { %1081 = vlog2.f32 %v286_v45 }
 0x1d4   :  { %v1080_v46 = vpop.eup %1079 }
 0x1d5   :  { %v278_v47 = vadd.f32 1.0, %v1080_v46 }
 0x1d7   :  { %v279_v49 = vmul.f32 0.5, %v278_v47 }
 0x1d9   :  { %v280_v53 = vmul.f32 %v279_v49, %v266_v34 }
 0x1e0   :  { %v1082_v50 = vpop.eup %1081 }
 0x1e1   :  { %v288_v52 = vmul.f32 0.6931472, %v1082_v50 }
 0x1e3   :  { %v289_v54 = vadd.f32 %v288_v52, %v281_v51 }
 0x1e5   :  { %v290_v55 = vsel %vm271_vm2, %v280_v53, %v289_v54 }
 0x1e6   :  { %1033 = vmatmul.mubr.msk.f32.vlgmr.msra.gmra.mxu0 %vm93_vm1, %v290_v55 }
 0x1e7   :  { %1053 = vmatprep.mubr.msk.f32.mxu0 %vm1159_vm0, %v1158_v1 }
 0x2a6   :  { %v376_v59 = vpop.f32.mrf.mxu0 }
 0x2a7   :  { %v377_v61 = vadd.f32 %v376_v59, %v294_v58 }
 0x2a8   :  { %v1034_v62 = vpop.f32.mrf.mxu0 }
 0x2a9   :  { %v383_v63 = vmul.f32 %v381_v60, %v377_v61 }
 0x2ab   :  { %385 = vrot.lane.b32.xlu1 %v383_v63, %s1162_s5 }
 0x31d   :  { %v386_v3 = vpop.permute.xlu1 %385 }
 0x31e   :  { %v388_v5 = vadd.f32 %v386_v3, %v377_v61 }
 0x320   :  { %v394_v9 = vmul.f32 %v392_v4, %v388_v5 }
 0x322   :  { %v504_v14 = vmul.f32 %v503_v7, %v394_v9  ;;  %v398_v15 = vmul.f32 %v397_v8, %v394_v9  ;;  %v428_v22 = vrot.slane %v394_v9, %v1284_v10 }
 0x324   :  { %v1287_v16 = vrot.slane %v504_v14, %v1284_v10  ;;  %v402_v17 = vrot.slane %v398_v15, %v1252_v12  ;;  %v413_v20 = vrot.slane %v398_v15, %v178_v31  ;;  %v436_v23 = vrot.slane %v428_v22, %v1284_v10 }
 0x325   :  { %v429_v24 = vcombine.high %v428_v22, %v428_v22 }
 0x326   :  { %408 = vbcast.lane.b32.xlu0 %v402_v17, 264  ;;  %404 = vbcast.lane.b32.xlu1 %v402_v17, 256  ;;  %v520_v18 = vrot.slane %v1287_v16, %v1284_v10  ;;  %v513_v19 = vcombine.high %v1287_v16, %v1287_v16  ;;  %v447_v25 = vrot.slane %v436_v23, %v1252_v12 }
 0x327   :  { %v443_v26 = vrot.slane %v429_v24, %v1284_v10  ;;  %v555_v24 = vld [vmem:[%s1371_s4 + $0x8] sm:$0xff] }
 0x328   :  { %v1295_v21 = vrot.slane %v513_v19, %v1284_v10  ;;  %v531_v4 = vrot.slane %v520_v18, %v1252_v12  ;;  %1036 = vmatpush3.msra.mxu1 %v555_v24 }
 0x329   :  { %v451_v32 = vrot.slane %v443_v26, %v1252_v12  ;;  %1037 = vmatprep.subr.mxu1 %v1158_v1  ;;  %v566_v26 = vsub.s32 %v1272_v48, %v1249_v11 }
 0x32a   :  { %419 = vbcast.lane.b32.xlu0 %v413_v20, 264  ;;  %415 = vbcast.lane.b32.xlu1 %v413_v20, 256  ;;  %v535_v20 = vrot.slane %v1295_v21, %v1252_v12  ;;  %v554_v12 = vld [vmem:[%s1371_s4] sm:$0xff]  ;;  %v568_v21 = vadd.s32 4294967288, %v1272_v48 }
 0x32b   :  { %1038 = vmatpush3.msra.mxu1 %v554_v12 }
 0x32c   :  { %1042 = vmatprep.subr.mxu1 %v1158_v1 }
 0x398   :  { %v409_v27 = vpop.permute.xlu0 %408  ;;  %v405_v28 = vpop.permute.xlu1 %404 }
 0x399   :  { %v455_v29 = vmul.f32 %v447_v25, %v409_v27  ;;  %v454_v30 = vmul.f32 %v447_v25, %v405_v28  ;;  %v571_v28 = vsub.s32 %v568_v21, %v1249_v11 }
 0x39b   :  { %v462_v31 = vsel %vm458_vm3, %v455_v29, -inf  ;;  %v459_v33 = vsel %vm458_vm3, %v454_v30, -inf }
 0x39c   :  { %463 = vmax.xlane.f32.xlu0 %v462_v31  ;;  %v420_v34 = vpop.permute.xlu0 %419  ;;  %460 = vmax.xlane.f32.xlu1 %v459_v33  ;;  %v416_v35 = vpop.permute.xlu1 %415 }
 0x39d   :  { %v457_v36 = vmul.f32 %v451_v32, %v420_v34  ;;  %v456_v37 = vmul.f32 %v451_v32, %v416_v35 }
 0x39f   :  { %v468_v38 = vsel %vm458_vm3, %v457_v36, -inf  ;;  %v465_v39 = vsel %vm458_vm3, %v456_v37, -inf }
 0x3a0   :  { %469 = vmax.xlane.f32.xlu1 %v468_v38  ;;  %466 = vmax.xlane.f32.xlu0 %v465_v39  ;;  %v558_v39 = vsub.s32 3, %v1249_v11 }
 0x425   :  { %v464_v40 = vpop.xlane.xlu0 %463  ;;  %v461_v41 = vpop.xlane.xlu1 %460 }
 0x426   :  { %v472_v42 = vsub.f32 %v455_v29, %v464_v40  ;;  %v471_v43 = vsub.f32 %v454_v30, %v461_v41  ;;  %v559_v40 = vrot.slane %v1257_v13, %v558_v39 }
 0x428   :  { %v477_v44 = vmul.f32 1.442695, %v472_v42  ;;  %v475_v45 = vmul.f32 1.442695, %v471_v43 }
 0x429   :  { %v467_v46 = vpop.xlane.xlu0 %466  ;;  %v470_v47 = vpop.xlane.xlu1 %469 }
 0x42a   :  { %1083 = vpow2.f32 %v477_v44  ;;  %v473_v49 = vsub.f32 %v456_v37, %v467_v46  ;;  %v474_v50 = vsub.f32 %v457_v36, %v470_v47 }
 0x42b   :  { %1085 = vpow2.f32 %v475_v45 }
 0x42c   :  { %v479_v51 = vmul.f32 1.442695, %v473_v49  ;;  %v481_v52 = vmul.f32 1.442695, %v474_v50 }
 0x42e   :  { %1087 = vpow2.f32 %v479_v51 }
 0x42f   :  { %1089 = vpow2.f32 %v481_v52 }
 0x437   :  { %v1084_v53 = vpop.eup %1083 }
 0x438   :  { %v1086_v54 = vpop.eup %1085  ;;  %v486_v55 = vsel %vm458_vm3, %v1084_v53, 0.0 }
 0x439   :  { %487 = vadd.xlane.f32.xlu1 %v486_v55  ;;  %v483_v56 = vsel %vm458_vm3, %v1086_v54, 0.0 }
 0x43a   :  { %484 = vadd.xlane.f32.xlu0 %v483_v56  ;;  %v669_v56 = vsub.s32 4, %v1249_v11 }
 0x43b   :  { %v1088_v57 = vpop.eup %1087 }
 0x43c   :  { %v1090_v58 = vpop.eup %1089  ;;  %v489_v59 = vsel %vm458_vm3, %v1088_v57, 0.0 }
 0x43d   :  { %v492_v60 = vsel %vm458_vm3, %v1090_v58, 0.0 }
 0x43e   :  { %490 = vadd.xlane.f32.xlu0 %v489_v59  ;;  %493 = vadd.xlane.f32.xlu1 %v492_v60 }
 0x4c2   :  { %v488_v61 = vpop.xlane.xlu1 %487 }
 0x4c3   :  { %v485_v62 = vpop.xlane.xlu0 %484  ;;  %1091 = vrcp.f32 %v488_v61 }
 0x4c4   :  { %1093 = vrcp.f32 %v485_v62 }
 0x4c7   :  { %v491_v63 = vpop.xlane.xlu0 %490  ;;  %v494_v0 = vpop.xlane.xlu1 %493 }
 0x4c8   :  { %1095 = vrcp.f32 %v491_v63 }
 0x4c9   :  { %1097 = vrcp.f32 %v494_v0 }
 0x4d0   :  { %v1092_v2 = vpop.eup %1091 }
 0x4d1   :  { %v1094_v3 = vpop.eup %1093  ;;  %v500_v5 = vmul.f32 %v1092_v2, %v1084_v53 }
 0x4d2   :  { %v499_v6 = vmul.f32 %v1094_v3, %v1086_v54 }
 0x4d3   :  { %v539_v7 = vmul.f32 %v531_v4, %v500_v5 }
 0x4d4   :  { %v538_v8 = vmul.f32 %v531_v4, %v499_v6 }
 0x4d5   :  { %v1096_v9 = vpop.eup %1095  ;;  %v545_v14 = vsel %vm458_vm3, %v539_v7, 0.0  ;;  %v40_v7 = vld [vmem:[%s1368_s1] sm:$0xff] }
 0x4d6   :  { %v1098_v15 = vpop.eup %1097  ;;  %v542_v17 = vsel %vm458_vm3, %v538_v8, 0.0  ;;  %546 = vadd.xlane.f32.xlu1 %v545_v14  ;;  %v501_v19 = vmul.f32 %v1096_v9, %v1088_v57  ;;  %v670_v57 = vrot.slane %v1257_v13, %v669_v56  ;;  %v43_v8 = vrot.slane %v40_v7, 4 }
 0x4d7   :  { %543 = vadd.xlane.f32.xlu0 %v542_v17  ;;  %v502_v22 = vmul.f32 %v1098_v15, %v1090_v58  ;;  %v41_v9 = vmul.f32 %v40_v7, %v40_v7 }
 0x4d8   :  { %v540_v23 = vmul.f32 %v535_v20, %v501_v19  ;;  %v45_v19 = vsub.f32 %v40_v7, %v43_v8 }
 0x4d9   :  { %v541_v10 = vmul.f32 %v535_v20, %v502_v22  ;;  %v57_v14 = vrot.slane %v41_v9, 4 }
 0x4da   :  { %v548_v16 = vsel %vm458_vm3, %v540_v23, 0.0  ;;  %v50_v20 = vmul.f32 %v45_v19, %v45_v19 }
 0x4db   :  { %549 = vadd.xlane.f32.xlu0 %v548_v16  ;;  %v551_v18 = vsel %vm458_vm3, %v541_v10, 0.0 }
 0x4dc   :  { %552 = vadd.xlane.f32.xlu1 %v551_v18  ;;  %v52_v22 = vrot.slane %v50_v20, 6 }
 0x4de   :  { %v54_v23 = vadd.f32 %v52_v22, %v41_v9 }
 0x4e0   :  { %v55_v10 = vmul.f32 0.5, %v54_v23 }
 0x4ed   :  { %673 = vrot.lane.b32.xlu1 %v554_v12, %s1162_s5 }
 0x4f1   :  { %675 = vrot.lane.b32.xlu0 %v555_v24, %s1162_s5  ;;  %767 = vrot.lane.b32.xlu1 %v555_v24, %s1160_s11 }
 0x4f5   :  { %765 = vrot.lane.b32.xlu0 %v554_v12, %s1160_s11  ;;  %859 = vrot.lane.b32.xlu1 %v555_v24, %s1163_s17 }
 0x4f9   :  { %857 = vrot.lane.b32.xlu0 %v554_v12, %s1163_s17 }
 0x55f   :  { %v547_v25 = vpop.xlane.xlu1 %546 }
 0x560   :  { %v544_v27 = vpop.xlane.xlu0 %543  ;;  %v572_v30 = vrot.slane %v547_v25, %v571_v28 }
 0x561   :  { %v567_v29 = vrot.slane %v544_v27, %v566_v26 }
 0x563   :  { %v574_v35 = vsel %vm573_vm4, %v572_v30, %v567_v29 }
 0x564   :  { %v550_v31 = vpop.xlane.xlu0 %549 }
 0x565   :  { %v578_v32 = vrot.slane %v550_v31, %v566_v26  ;;  %v553_v33 = vpop.xlane.xlu1 %552  ;;  %v763_v31 = vsub.s32 5, %v1249_v11 }
 0x566   :  { %v582_v34 = vrot.slane %v553_v33, %v571_v28 }
 0x568   :  { %v583_v36 = vsel %vm573_vm4, %v582_v34, %v578_v32  ;;  %v676_v48 = vpop.permute.xlu0 %675  ;;  %v764_v32 = vrot.slane %v1257_v13, %v763_v31 }
 0x569   :  { %v585_v37 = vsel %vm584_vm5, %v583_v36, %v574_v35  ;;  %v674_v38 = vpop.permute.xlu1 %673 }
 0x56a   :  { %1040 = vmatmul.mubr.msk.f32.vlgmr.msra.gmra.mxu1 %vm458_vm3, %v585_v37 }
 0x56b   :  { %1046 = vmatprep.mubr.msk.f32.mxu1 %vm1159_vm0, %v1158_v1  ;;  %1043 = vmatpush3.msra.mxu1 %v676_v48 }
 0x56c   :  { %1044 = vmatprep.subr.mxu1 %v1158_v1  ;;  %v766_v55 = vpop.permute.xlu0 %765 }
 0x56d   :  { %1045 = vmatpush3.msra.mxu1 %v674_v38  ;;  %v768_v54 = vpop.permute.xlu1 %767 }
 0x56e   :  { %1056 = vmatprep.subr.mxu1 %v1158_v1  ;;  %1050 = vmatpush3.msra.mxu0 %v768_v54 }
 0x56f   :  { %1051 = vmatprep.subr.mxu0 %v1158_v1 }
 0x570   :  { %1052 = vmatpush3.msra.mxu0 %v766_v55  ;;  %v858_v30 = vpop.permute.xlu0 %857 }
 0x571   :  { %v860_v29 = vpop.permute.xlu1 %859 }
 0x62a   :  { %v654_v41 = vpop.f32.mrf.mxu1 }
 0x62b   :  { %v655_v42 = vadd.f32 %v654_v41, %v559_v40 }
 0x62c   :  { %v1041_v43 = vpop.f32.mrf.mxu1 }
 0x62d   :  { %v658_v44 = vmul.f32 %v655_v42, %v655_v42 }
 0x62f   :  { %v659_v45 = vmul.f32 %v658_v44, %v655_v42 }
 0x631   :  { %v660_v46 = vmul.f32 0.044715, %v659_v45 }
 0x633   :  { %v661_v47 = vadd.f32 %v660_v46, %v655_v42 }
 0x635   :  { %v662_v49 = vmul.f32 0.7978846, %v661_v47 }
 0x637   :  { %1099 = vtanh.f32 %v662_v49 }
 0x644   :  { %v1100_v50 = vpop.eup %1099 }
 0x645   :  { %v664_v51 = vadd.f32 1.0, %v1100_v50 }
 0x647   :  { %v665_v52 = vmul.f32 0.5, %v664_v51  ;;  %v855_v51 = vsub.s32 6, %v1249_v11 }
 0x649   :  { %v666_v53 = vmul.f32 %v665_v52, %v655_v42  ;;  %v856_v52 = vrot.slane %v1257_v13, %v855_v51 }
 0x64b   :  { %1047 = vmatmul.mubr.msk.f32.vlgmr.msra.gmra.mxu1 %vm458_vm3, %v666_v53 }
 0x64c   :  { %1060 = vmatprep.mubr.msk.f32.mxu1 %vm1159_vm0, %v1158_v1  ;;  %1057 = vmatpush3.msra.mxu1 %v860_v29 }
 0x64d   :  { %1058 = vmatprep.subr.mxu1 %v1158_v1 }
 0x64e   :  { %1059 = vmatpush3.msra.mxu1 %v858_v30 }
 0x70b   :  { %v748_v58 = vpop.f32.mrf.mxu1 }
 0x70c   :  { %v749_v59 = vadd.f32 %v748_v58, %v670_v57 }
 0x70d   :  { %v1048_v60 = vpop.f32.mrf.mxu1 }
 0x70e   :  { %v752_v61 = vmul.f32 %v749_v59, %v749_v59 }
 0x710   :  { %v753_v62 = vmul.f32 %v752_v61, %v749_v59 }
 0x712   :  { %v754_v63 = vmul.f32 0.044715, %v753_v62 }
 0x714   :  { %v755_v0 = vadd.f32 %v754_v63, %v749_v59 }
 0x716   :  { %v756_v2 = vmul.f32 0.7978846, %v755_v0 }
 0x718   :  { %1101 = vtanh.f32 %v756_v2 }
 0x719   :  { %1103 = vrcp.f32 %v43_v8 }
 0x71a   :  { %1105 = vrcp.f32 %v57_v14 }
 0x725   :  { %v1102_v3 = vpop.eup %1101 }
 0x726   :  { %v758_v4 = vadd.f32 1.0, %v1102_v3  ;;  %v1104_v15 = vpop.eup %1103 }
 0x727   :  { %v47_v17 = vmul.f32 %v1104_v15, %v40_v7  ;;  %v1106_v16 = vpop.eup %1105 }
 0x728   :  { %v759_v5 = vmul.f32 0.5, %v758_v4  ;;  %v60_v18 = vmul.f32 %v1106_v16, %v55_v10 }
 0x729   :  { %1107 = vlog2.f32 %v47_v17 }
 0x72a   :  { %v760_v6 = vmul.f32 %v759_v5, %v749_v59  ;;  %v62_v21 = vrot.slane %v60_v18, 4 }
 0x72c   :  { %1054 = vmatmul.mubr.msk.f32.vlgmr.msra.gmra.mxu0 %vm458_vm3, %v760_v6 }
 0x736   :  { %v1108_v24 = vpop.eup %1107 }
 0x737   :  { %v49_v12 = vmul.f32 0.6931472, %v1108_v24 }
 0x739   :  { %v64_v25 = vadd.f32 %v62_v21, %v49_v12 }
 0x73b   :  { %v966_v26 = vadd.f32 -0.5, %v64_v25 }
 0x73d   :  { %v67_v27 = vrot.slane %v966_v26, 2 }
 0x73f   :  { %v70_v28 = vsel %vm69_vm6, %v67_v27, 0.0 }
 0x740   :  { %71 = vadd.xlane.f32.xlu1 %v70_v28 }
 0x7c9   :  { %v72_v43 = vpop.xlane.xlu1 %71 }
 0x7ca   :  { %v73_v44 = vrot.slane %v72_v43, 4 }
 0x7cc   :  { %v74_v45 = vadd.f32 %v73_v44, %v72_v43 }
 0x7ce   :  { %v75_v46 = vrot.slane %v74_v45, 2 }
 0x7d0   :  { %v76_v47 = vadd.f32 %v75_v46, %v74_v45 }
 0x7d2   :  { %v77_v49 = vrot.slane %v76_v47, 1 }
 0x7d4   :  { %v78_v50 = vadd.f32 %v77_v49, %v76_v47 }
 0x7d6   :  { %1063 = vpush %v78_v50 }
 0x7ec   :  { %v840_v33 = vpop.f32.mrf.mxu0 }
 0x7ed   :  { %v841_v34 = vadd.f32 %v840_v33, %v764_v32 }
 0x7ee   :  { %v1055_v35 = vpop.f32.mrf.mxu0 }
 0x7ef   :  { %v844_v36 = vmul.f32 %v841_v34, %v841_v34 }
 0x7f1   :  { %v845_v37 = vmul.f32 %v844_v36, %v841_v34 }
 0x7f3   :  { %v846_v48 = vmul.f32 0.044715, %v845_v37 }
 0x7f5   :  { %v847_v38 = vadd.f32 %v846_v48, %v841_v34 }
 0x7f7   :  { %v848_v39 = vmul.f32 0.7978846, %v847_v38 }
 0x7f9   :  { %1109 = vtanh.f32 %v848_v39 }
 0x806   :  { %v1110_v40 = vpop.eup %1109 }
 0x807   :  { %v850_v41 = vadd.f32 1.0, %v1110_v40  ;;  %s1064_s1 = spop %1063 }
 0x808   :  { %s80_s25 = smul.f32 0.5, %s1064_s1 }
 0x809   :  { %v851_v42 = vmul.f32 0.5, %v850_v41 }
 0x80a   :  { %82 = sst [smem:[#allocation7]] %s80_s25 }
 0x80b   :  { %v852_v1 = vmul.f32 %v851_v42, %v841_v34  ;;  %955 = dma.smem_to_hbm %s1165_s26, 16, %s1374_s7, [#allocation4]  }
 0x80d   :  { %1061 = vmatmul.mubr.msk.f32.vlgmr.msra.gmra.mxu1 %vm458_vm3, %v852_v1 }
 0x8cd   :  { %v932_v53 = vpop.f32.mrf.mxu1 }
 0x8ce   :  { %v933_v54 = vadd.f32 %v932_v53, %v856_v52 }
 0x8cf   :  { %v1062_v55 = vpop.f32.mrf.mxu1 }
 0x8d0   :  { %937 = vst.msk [vmem:[#allocation6] sm:$0x3] %vm936_vm7, %v933_v54 }
 0x8d1   :  { %1142 = shalt.err (!%p1139_p9)
}
 0x8d2   :  { %947 = dma.vmem_to_hbm [thread:$0]  %s945_s30, 32, %s1373_s6, [#allocation3]  }
 0x8d3   :  { %1153 = dma.done.wait [#allocation3], 32  }
 0x8d4   :  { %1154 = vsyncadd [#allocation3], 4294967264 }
 0x8d5   :  { %1155 = dma.done.wait [#allocation4], 16  }
 0x8d6   :  { %1156 = vsyncadd [#allocation4], 4294967280 }
 0x8d7   :  { %962 = sfence }
 0x8d8   :  { %963 = vsyncpa [#allocation3], 1 }
 0x8d9   :  { %964 = vsyncpa [#allocation4], 1 }
 0x8da   :  { %965 = vsyncpa [#allocation5], 1 }

</bundles_post_ra>
